<compile_context>
chip_gen: v5e
topology: v5e:2x2
jax: 0.10.0
libtpu: 0.0.40
codegen_flags: <defaults>
</compile_context>

<pallas_src>
import jax
import jax.numpy as jnp
from jax.experimental import pallas as pl
from jax.experimental.pallas import tpu as pltpu

_LANE = 128


def _make_kernel(batch, tile_b, ragged):
    def kernel(m_ref, o_ref):
        # m_ref: (G, tile_b) strictly-positive means, lane-dense along batch.
        m = m_ref[...].astype(jnp.float32)          # native-dtype DMA, f32 compute
        if ragged:
            # Last tile overhangs the batch: set out-of-range lanes to 1.0 so
            # log(1) = 0 and they contribute nothing (select -> no NaN leak).
            i = pl.program_id(0)
            valid = batch - i * tile_b
            lane = jax.lax.broadcasted_iota(jnp.int32, m.shape, dimension=1)
            m = jnp.where(lane < valid, m, 1.0)
        lm = jnp.log(m)                              # one EUP log per element
        diff = lm[:-1, :] - lm[1:, :]                # log(m_i / m_{i+1}) per adjacent pair
        relu = jnp.maximum(diff, 0.0)
        # Sublane-first reduce: (G-1) VPU adds per lane, then one XLU cross-lane pass.
        per_lane = jnp.sum(relu, axis=0, keepdims=True)      # (1, tile_b)
        partial = jnp.sum(per_lane)
        # Lane-dense (1, 128) store of the per-tile partial sum (unmasked vst).
        o_ref[...] = jnp.full(o_ref.shape, partial, dtype=o_ref.dtype)
    return kernel


def ascending_mean_loss(x, *, max_tile_b=65536, vmem_budget_bytes=4 * 1024 * 1024):
    B, G, D = x.shape
    if G <= 1:
        raise ValueError("Doesn't make sense")

    # Single relayout pass in the wrapper: slice the one used feature column and
    # go lane-dense (G, B) so batch maps onto the 128-wide lane axis.  Keep the
    # native dtype (no up-cast, no pad) so this is one copy and the kernel's
    # input DMA is B*G*itemsize bytes total.
    m = jnp.transpose(x[..., 0])                                 # (G, B)
    itemsize = jnp.dtype(m.dtype).itemsize

    # Tile choice: as large as possible (per-grid-step overhead ~0.35 us), but
    #  * double-buffered (G, tile_b) input block within the VMEM budget,
    #  * lane-aligned (multiple of 128),
    #  * >= 2 tiles when B allows, so both v7x TensorCores get work.
    budget_tile = max(_LANE, vmem_budget_bytes // (2 * G * itemsize))
    two_way_tile = pl.cdiv(pl.cdiv(B, 2), _LANE) * _LANE
    tile_b = min(max_tile_b, budget_tile, two_way_tile)
    tile_b = max(_LANE, (tile_b // _LANE) * _LANE)               # lane-aligned
    num_tiles = pl.cdiv(B, tile_b)
    ragged = (B % tile_b) != 0

    cost = pl.CostEstimate(
        flops=3 * B * G,                     # diff + relu + add per element
        transcendentals=B * G,               # one log per element
        bytes_accessed=B * G * itemsize + num_tiles * _LANE * 4,
    )

    partials = pl.pallas_call(
        _make_kernel(B, tile_b, ragged),
        out_shape=jax.ShapeDtypeStruct((num_tiles, _LANE), jnp.float32),
        grid=(num_tiles,),
        in_specs=[pl.BlockSpec((G, tile_b), lambda i: (0, i))],
        out_specs=pl.BlockSpec((1, _LANE), lambda i: (i, 0)),
        compiler_params=pltpu.CompilerParams(
            dimension_semantics=("parallel",)),                  # v7x: both TCs
        cost_estimate=cost,
    )(m)
    return jnp.sum(partials[:, 0])


def ascending_mean_loss_ref(x):
    # Pure-JAX reference of the PyTorch forward.
    m = x[..., 0].astype(jnp.float32)
    return jnp.sum(jnp.maximum(jnp.log(m[:, :-1] / m[:, 1:]), 0.0))


if __name__ == "__main__":
    # Small shape consistent with the module's (batch, groups, features) input.
    key = jax.random.PRNGKey(0)
    B, G, D = 2, 8, 4
    # strictly positive values, as the loss's log() assumes
    x = jax.random.uniform(key, (B, G, D), jnp.float32, minval=0.5, maxval=2.0)
    loss = jax.block_until_ready(ascending_mean_loss(x))
    ref = ascending_mean_loss_ref(x)
    assert jnp.allclose(loss, ref, rtol=1e-5, atol=1e-5), (loss, ref)

    # Larger batch: exercises the multi-tile "parallel" grid and the in-kernel
    # ragged-lane mask (1000 % 512 != 0), with no wrapper pad pass.
    x2 = jax.random.uniform(jax.random.PRNGKey(1), (1000, 6, 16),
                            jnp.float32, minval=0.5, maxval=2.0)
    loss2 = jax.block_until_ready(ascending_mean_loss(x2))
    ref2 = ascending_mean_loss_ref(x2)
    assert jnp.allclose(loss2, ref2, rtol=1e-4, atol=1e-4), (loss2, ref2)

    # bf16 input: kernel DMAs bf16 (half the HBM bytes) and upcasts in VMEM.
    x3 = jax.random.uniform(jax.random.PRNGKey(2), (384, 4, 8),
                            jnp.float32, minval=0.5, maxval=2.0).astype(jnp.bfloat16)
    loss3 = jax.block_until_ready(ascending_mean_loss(x3))
    ref3 = ascending_mean_loss_ref(x3)
    assert jnp.allclose(loss3, ref3, rtol=1e-3, atol=1e-3), (loss3, ref3)

    print("KERNEL_OK")
</pallas_src>

<mosaic_0001>
module attributes {stable_mosaic.version = 11 : i64} {
  func.func @kernel(%arg0: i32, %arg1: memref<8x128xf32, #tpu.memory_space<vmem>>, %arg2: memref<1x128xf32, #tpu.memory_space<vmem>>) attributes {dimension_semantics = [#tpu.dimension_semantics<parallel>], iteration_bounds = array<i64: 1>, scalar_prefetch = 0 : i64, scratch_operands = 0 : i64, tpu.core_type = #tpu.core_type<tc>, window_params = [{transform_indices = @transform_0, window_bounds = array<i64: 8, 128>}, {transform_indices = @transform_1, window_bounds = array<i64: 1, 128>}]} {
    %c0 = arith.constant 0 : index
    %c0_0 = arith.constant 0 : index
    %0 = vector.load %arg1[%c0, %c0_0] : memref<8x128xf32, #tpu.memory_space<vmem>>, vector<8x128xf32>
    %c128_i32 = arith.constant 128 : i32
    %1 = arith.muli %arg0, %c128_i32 : i32
    %c2_i32 = arith.constant 2 : i32
    %2 = arith.subi %c2_i32, %1 : i32
    %3 = tpu.iota {dimensions = array<i32: 1>} : vector<8x128xi32>
    %4 = vector.broadcast %2 : i32 to vector<8x128xi32>
    %5 = arith.cmpi slt, %3, %4 : vector<8x128xi32>
    %cst = arith.constant 1.000000e+00 : f32
    %6 = vector.broadcast %cst : f32 to vector<8x128xf32>
    %7 = arith.select %5, %0, %6 : vector<8x128xi1>, vector<8x128xf32>
    %8 = math.log %7 : vector<8x128xf32>
    %9 = vector.extract_strided_slice %8 {offsets = [0, 0], sizes = [7, 128], strides = [1, 1]} : vector<8x128xf32> to vector<7x128xf32>
    %10 = vector.extract_strided_slice %8 {offsets = [1, 0], sizes = [7, 128], strides = [1, 1]} : vector<8x128xf32> to vector<7x128xf32>
    %11 = arith.subf %9, %10 : vector<7x128xf32>
    %cst_1 = arith.constant 0.000000e+00 : f32
    %12 = vector.broadcast %cst_1 : f32 to vector<7x128xf32>
    %13 = arith.maximumf %11, %12 : vector<7x128xf32>
    %cst_2 = arith.constant dense<0.000000e+00> : vector<128xf32>
    %14 = vector.multi_reduction <add>, %13, %cst_2 [0] : vector<7x128xf32> to vector<128xf32>
    %15 = vector.shape_cast %14 : vector<128xf32> to vector<1x128xf32>
    %16 = vector.shape_cast %15 : vector<1x128xf32> to vector<1x1x128xf32>
    %cst_3 = arith.constant dense<0.000000e+00> : vector<1xf32>
    %17 = vector.multi_reduction <add>, %16, %cst_3 [1, 2] : vector<1x1x128xf32> to vector<1xf32>
    %18 = vector.shape_cast %17 : vector<1xf32> to vector<1x1x1xf32>
    %19 = vector.extract %18[0, 0, 0] : f32 from vector<1x1x1xf32>
    %20 = vector.broadcast %19 : f32 to vector<1x128xf32>
    %c0_4 = arith.constant 0 : index
    %c0_5 = arith.constant 0 : index
    %21 = vector.load %arg2[%c0_4, %c0_5] : memref<1x128xf32, #tpu.memory_space<vmem>>, vector<1x128xf32>
    tpu.vector_store %arg2[%c0_4, %c0_5], %20 {strides = array<i32>} : memref<1x128xf32, #tpu.memory_space<vmem>>, vector<1x128xf32>,
    return
  }
  func.func @transform_0(%arg0: i32) -> (i32, i32) {
    %c0_i32 = arith.constant 0 : i32
    %c0_i32_0 = arith.constant 0 : i32
    return %c0_i32, %arg0 : i32, i32
  }
  func.func @transform_1(%arg0: i32) -> (i32, i32) {
    %c0_i32 = arith.constant 0 : i32
    %c0_i32_0 = arith.constant 0 : i32
    return %arg0, %c0_i32 : i32, i32
  }
}

</mosaic_0001>

<bundles_post_ra>
// kernel: tpu_custom_call.1
= control target key start
LH: loop header
LB: loop body
LE: loop exit
PB: predicated region body
PF: predicated region fallthrough
CT: control target
= control target key end

     0   :  { %v12_v0 = vlaneseq  ;;  %s109_s0 = inlined_call_operand.vmem [shape: f32[8,2], index: 0, kind: input, shape index: {}]   ;;  %s110_s1 = inlined_call_operand.hbm [shape: f32[1,128], index: 1, kind: output, shape index: {}]  }
   0x1   :  { %6 = vsyncpa [#allocation3], 0  ;;  %v9_v1 = vld [vmem:[%s109_s0] sm:$0xff]  ;;  %vm24_vm1 = vcmask 1046528   ;;  %vm32_vm2 = vcmask 1040384   ;;  %s92_s0 = smov [#allocation2]  }
   0x2   :  { %v13_v2 = vand.u32 127, %v12_v0  ;;  %s50_s8 = sshll.u32 %s92_s0, 4  ;;  %s52_s11 = sshll.u32 %s110_s1, 4  ;;  %s51_s8 = int_to_ptr.vmem [resolvable:$true] %s50_s8  ;;  %s53_s11 = int_to_ptr.hbm [resolvable:$true] %s52_s11 }
   0x4   :  { %vm15_vm0 = vcmp.lt.s32.totalorder %v13_v2, 2 }
   0x5   :  { %v16_v3 = vsel %vm15_vm0, %v9_v1, 1.0 }
   0x6   :  { %64 = vlog2.f32 %v16_v3 }
   0xc   :  { %v65_v4 = vpop.eup %64 }
   0xd   :  { %v18_v5 = vmul.f32 0.6931472, %v65_v4 }
   0xf   :  { %v20_v6 = vrot.slane %v18_v5, 1 }
  0x11   :  { %v22_v7 = vsub.f32 %v18_v5, %v20_v6 }
  0x13   :  { %v23_v8 = vmax.f32 %v22_v7, 0.0 }
  0x15   :  { %v25_v9 = vsel %vm24_vm1, %v23_v8, 0.0 }
  0x16   :  { %v26_v10 = vrot.slane %v25_v9, 4 }
  0x18   :  { %v27_v11 = vadd.f32 %v26_v10, %v25_v9 }
  0x1a   :  { %v28_v12 = vrot.slane %v27_v11, 2 }
  0x1c   :  { %v29_v13 = vadd.f32 %v28_v12, %v27_v11 }
  0x1e   :  { %v30_v14 = vrot.slane %v29_v13, 1 }
  0x20   :  { %v31_v15 = vadd.f32 %v30_v14, %v29_v13 }
  0x22   :  { %v33_v16 = vsel %vm32_vm2, %v31_v15, 0.0 }
  0x23   :  { %34 = vadd.xlane.f32.xlu0 %v33_v16 }
  0x96   :  { %v35_v17 = vpop.xlane.xlu0 %34 }
  0x97   :  { %v36_v18 = vrot.slane %v35_v17, 4 }
  0x99   :  { %v37_v19 = vadd.f32 %v36_v18, %v35_v17 }
  0x9b   :  { %v38_v20 = vrot.slane %v37_v19, 2 }
  0x9d   :  { %v39_v21 = vadd.f32 %v38_v20, %v37_v19 }
  0x9f   :  { %v40_v22 = vrot.slane %v39_v21, 1 }
  0xa1   :  { %v41_v23 = vadd.f32 %v40_v22, %v39_v21 }
  0xa3   :  { %61 = vpush %v41_v23 }
  0xd4   :  { %s62_s12 = spop %61 }
  0xd5   :  { %v43_v24 = vstv %s62_s12 }
  0xd6   :  { %44 = vst [vmem:[#allocation2] sm:$0x1] %v43_v24 }
  0xd7   :  { %55 = dma.vmem_to_hbm [thread:$0]  %s51_s8, 16, %s53_s11, [#allocation3]  }
  0xd8   :  { %90 = dma.done.wait [#allocation3], 16  }
  0xd9   :  { %91 = vsyncadd [#allocation3], 4294967280 }
  0xda   :  { %60 = vsyncpa [#allocation3], 1 }

</bundles_post_ra>
